<compile_context>
chip_gen: v6e
topology: v6e:2x2x1
jax: 0.10.0
libtpu: 0.0.40
codegen_flags: <defaults>
</compile_context>

<pallas_src>
import jax
import jax.numpy as jnp
from jax.experimental import pallas as pl
from jax.experimental.pallas import tpu as pltpu


# --------------------------------------------------------------------------
# Small helpers
# --------------------------------------------------------------------------
def _round_up(x, m):
    return ((x + m - 1) // m) * m


def _round_down(x, m):
    return (x // m) * m


def _sublane_unit(dtype):
    # f32 -> 8, bf16 -> 16, int8/fp8 -> 32 (sub-32-bit packs along sublanes).
    return 8 * max(1, 4 // jnp.dtype(dtype).itemsize)


def _pick_k_tile(e_pad, desired):
    """Largest multiple of 128 that divides e_pad and is <= desired (e_pad is a
    multiple of 128 by construction, so 128 always works)."""
    if e_pad <= desired:
        return e_pad
    tk = _round_down(min(desired, e_pad), 128)
    while tk >= 128:
        if e_pad % tk == 0:
            return tk
        tk -= 128
    return 128


# --------------------------------------------------------------------------
# One-time parameter layout prep (call at load time, NOT per forward).
# --------------------------------------------------------------------------
def prepare_fused_qkv_params(w_fused, b_fused, splits, *, param_dtype=None):
    """w_fused: (sum(splits), emb_dim) torch-Linear layout; b_fused: (sum(splits),) or None.

    Returns (w_cat, b_cat, meta):
      w_cat: (E_pad, sum(splits_padded)) — per-projection transposed weights,
             zero-padded to 128-multiples on both axes and concatenated.
      b_cat: (1, sum(splits_padded)) float32, or None.
      meta:  dict with original/padded dims.
    """
    w = jnp.asarray(w_fused)
    if param_dtype is not None:
        w = w.astype(param_dtype)
    s = [int(x) for x in splits]
    E = int(w.shape[1])
    E_pad = _round_up(E, 128)
    s_pad = [_round_up(si, 128) for si in s]

    parts, off = [], 0
    for si, spi in zip(s, s_pad):
        wi = w[off:off + si].T                                  # (E, si)
        wi = jnp.pad(wi, ((0, E_pad - E), (0, spi - si)))       # (E_pad, si_pad)
        parts.append(wi)
        off += si
    w_cat = jnp.concatenate(parts, axis=1)                      # (E_pad, sumN_pad)

    if b_fused is None:
        b_cat = None
    else:
        b = jnp.asarray(b_fused).astype(jnp.float32)
        bparts, off = [], 0
        for si, spi in zip(s, s_pad):
            bparts.append(jnp.pad(b[off:off + si], (0, spi - si)))
            off += si
        b_cat = jnp.concatenate(bparts).reshape(1, -1)          # (1, sumN_pad) f32

    meta = dict(emb_dim=E, emb_dim_padded=E_pad,
                splits=tuple(s), splits_padded=tuple(s_pad))
    return w_cat, b_cat, meta


# --------------------------------------------------------------------------
# Generation-aware tile / VMEM-limit selection
# --------------------------------------------------------------------------
def _select_tiles(M, E_pad, N_pad, x_dtype, w_dtype, out_dtype, has_bias,
                  tm, tk, vmem_limit_bytes):
    try:
        info = pltpu.get_tpu_info()
        vmem_cap = int(getattr(info, "vmem_capacity_bytes", 0)) or 128 * 1024 * 1024
    except Exception:
        vmem_cap = 128 * 1024 * 1024
    small_vmem = vmem_cap <= 64 * 1024 * 1024          # v7x-class: 64 MiB/TC, 2 TCs

    if vmem_limit_bytes is None:
        vmem_limit_bytes = (vmem_cap * 13) // 16        # ~104 MiB of 128, ~52 MiB of 64

    unit = _sublane_unit(x_dtype)
    if tk is None:
        tk = 256 if small_vmem else 512
    tk = _pick_k_tile(E_pad, tk)
    if tm is None:
        tm = 512 if small_vmem else 1024
    tm = M if M <= tm else _round_down(tm, unit)

    x_it = jnp.dtype(x_dtype).itemsize
    w_it = jnp.dtype(w_dtype).itemsize
    o_it = jnp.dtype(out_dtype).itemsize
    budget = vmem_limit_bytes - (2 << 20)               # headroom for compiler scratch

    def usage(tm_, tk_, w_bufs_):
        return (tm_ * N_pad * 4                          # f32 accumulator
                + 2 * tm_ * tk_ * x_it                   # double-buffered x tiles
                + w_bufs_ * tk_ * N_pad * w_it           # weight tiles
                + 2 * tm_ * N_pad * o_it                 # double-buffered out tiles
                + (2 * N_pad * 4 if has_bias else 0))

    while usage(tm, tk, 2) > budget and tm > unit:
        tm = max(unit, _round_down(max(tm // 2, unit), unit))
    while usage(tm, tk, 2) > budget and tk > 128:
        tk = _pick_k_tile(E_pad, max(128, tk // 2))

    # v7x has 2 TensorCores: give the "parallel" M axis >= 2 tiles when possible.
    if small_vmem and pl.cdiv(M, tm) < 2 and M >= 2 * unit:
        tm = _round_up(pl.cdiv(M, 2), unit)

    # Decode / single-M-tile regime is pure weight streaming: deepen the weight
    # pipeline when there is headroom.
    w_bufs = 2
    if pl.cdiv(M, tm) == 1 and (E_pad // tk) >= 4 and usage(tm, tk, 3) <= budget:
        w_bufs = 3

    return tm, tk, int(vmem_limit_bytes), w_bufs


# --------------------------------------------------------------------------
# Kernel
# --------------------------------------------------------------------------
def _make_fused_qkv_kernel(offsets, widths, has_bias):
    def kernel(*refs):
        if has_bias:
            x_ref, w_ref, b_ref, q_ref, k_ref, v_ref, acc_ref = refs
        else:
            x_ref, w_ref, q_ref, k_ref, v_ref, acc_ref = refs
            b_ref = None
        kk = pl.program_id(1)

        @pl.when(kk == 0)
        def _init():
            acc_ref[...] = jnp.zeros_like(acc_ref)

        # One fused MXU sweep over all of Q/K/V per grid step.
        acc_ref[...] += jnp.dot(x_ref[...], w_ref[...],
                                preferred_element_type=jnp.float32)

        @pl.when(kk == pl.num_programs(1) - 1)
        def _epilogue():
            for o_ref, off, w in zip((q_ref, k_ref, v_ref), offsets, widths):
                y = acc_ref[:, off:off + w]                 # 128-aligned static slice
                if has_bias:
                    y = y + b_ref[:, off:off + w]           # bias already f32
                o_ref[...] = y.astype(o_ref.dtype)

    return kernel


# --------------------------------------------------------------------------
# Forward wrapper
# --------------------------------------------------------------------------
def fused_qkv_forward(x, w_cat, b_cat, meta, *, tm=None, tk=None,
                      vmem_limit_bytes=None):
    """x: (B, S, emb_dim).  (w_cat, b_cat, meta) from prepare_fused_qkv_params.
    Returns (q, k, v) with shapes (B, S, split_i)."""
    B, S, E = x.shape
    assert E == meta["emb_dim"], "x feature dim does not match fused weight"
    E_pad = meta["emb_dim_padded"]
    s = meta["splits"]
    s_pad = meta["splits_padded"]
    N_pad = sum(s_pad)
    offsets = (0, s_pad[0], s_pad[0] + s_pad[1])
    M = B * S
    out_dtype = x.dtype
    has_bias = b_cat is not None

    x2d = x.reshape(M, E)
    if E_pad != E:
        # Rare (E not a multiple of 128): zero-pad the contraction dim once.
        x2d = jnp.pad(x2d, ((0, 0), (0, E_pad - E)))

    tm, tk, vmem_limit_bytes, w_bufs = _select_tiles(
        M, E_pad, N_pad, x.dtype, w_cat.dtype, out_dtype, has_bias,
        tm, tk, vmem_limit_bytes)

    grid_m = pl.cdiv(M, tm)
    grid = (grid_m, E_pad // tk)

    x_it = jnp.dtype(x.dtype).itemsize
    w_it = jnp.dtype(w_cat.dtype).itemsize
    o_it = jnp.dtype(out_dtype).itemsize
    cost = pl.CostEstimate(
        flops=2 * M * E_pad * N_pad,
        transcendentals=0,
        # Weights are re-streamed once per M tile (their index_map depends only
        # on the K grid index).
        bytes_accessed=(M * E_pad * x_it
                        + grid_m * E_pad * N_pad * w_it
                        + M * N_pad * o_it
                        + (N_pad * 4 if has_bias else 0)),
    )

    x_spec = pl.BlockSpec((tm, tk), lambda i, k: (i, k))
    w_index = lambda i, k: (k, 0)
    w_spec = pl.BlockSpec((tk, N_pad), w_index)
    if w_bufs > 2 and hasattr(pl, "Buffered"):
        try:
            w_spec = pl.BlockSpec((tk, N_pad), w_index,
                                  pipeline_mode=pl.Buffered(w_bufs))
        except TypeError:
            pass  # older API without pipeline_mode: fall back to default depth

    in_specs = [x_spec, w_spec]
    operands = [x2d, w_cat]
    if has_bias:
        in_specs.append(pl.BlockSpec((1, N_pad), lambda i, k: (0, 0)))
        operands.append(b_cat)

    out_specs = [pl.BlockSpec((tm, sp), lambda i, k: (i, 0)) for sp in s_pad]
    out_shapes = tuple(jax.ShapeDtypeStruct((M, sp), out_dtype) for sp in s_pad)

    kernel = _make_fused_qkv_kernel(offsets, tuple(s_pad), has_bias)

    q2d, k2d, v2d = pl.pallas_call(
        kernel,
        out_shape=out_shapes,
        grid_spec=pltpu.PrefetchScalarGridSpec(
            num_scalar_prefetch=0,
            grid=grid,
            in_specs=in_specs,
            out_specs=out_specs,
            scratch_shapes=[pltpu.VMEM((tm, N_pad), jnp.float32)],
        ),
        compiler_params=pltpu.CompilerParams(
            dimension_semantics=("parallel", "arbitrary"),
            vmem_limit_bytes=vmem_limit_bytes,
        ),
        cost_estimate=cost,
    )(*operands)

    def _finish(y2d, width):
        y = y2d.reshape(B, S, y2d.shape[-1])
        return y[..., :width] if y2d.shape[-1] != width else y

    return _finish(q2d, s[0]), _finish(k2d, s[1]), _finish(v2d, s[2])


# --------------------------------------------------------------------------
# Self-test helpers
# --------------------------------------------------------------------------
def _trunc_normal(key, shape, std=0.02, dtype=jnp.float32):
    # matches nn.init.trunc_normal_(mean=0, std=0.02), clipped at +/- 2 stds
    return std * jax.random.truncated_normal(key, -2.0, 2.0, shape, dtype)


def _reference(x, w_fused, b_fused, splits):
    y = jnp.dot(x.astype(jnp.float32), w_fused.astype(jnp.float32).T)
    if b_fused is not None:
        y = y + b_fused.astype(jnp.float32)
    s0, s1, s2 = splits
    return y[..., :s0], y[..., s0:s0 + s1], y[..., s0 + s1:s0 + s1 + s2]


if __name__ == "__main__":
    key = jax.random.PRNGKey(0)

    # ------------------------------------------------------------------
    # Check 1: module-consistent small config (FusedQKV defaults after
    # reset_parameters -> trunc-normal weight, zero bias), f32.
    # ------------------------------------------------------------------
    emb_dim, nheads, kvheads = 32, 4, 2
    emb_kq_per_head = emb_v_per_head = 8
    splits = [nheads * emb_kq_per_head,
              kvheads * emb_kq_per_head,
              kvheads * emb_v_per_head]            # [32, 16, 16]
    B, S = 2, 8

    kx, kw, key = jax.random.split(key, 3)
    x = jax.random.normal(kx, (B, S, emb_dim), dtype=jnp.float32)
    w_fused = _trunc_normal(kw, (sum(splits), emb_dim))
    b_fused = jnp.zeros((sum(splits),), dtype=jnp.float32)

    w_cat, b_cat, meta = prepare_fused_qkv_params(w_fused, b_fused, splits)
    q, k, v = fused_qkv_forward(x, w_cat, b_cat, meta)
    jax.block_until_ready((q, k, v))

    rq, rk, rv = _reference(x, w_fused, b_fused, splits)
    assert q.shape == (B, S, splits[0]) and k.shape == (B, S, splits[1]) and v.shape == (B, S, splits[2])
    assert jnp.allclose(q, rq, atol=1e-5)
    assert jnp.allclose(k, rk, atol=1e-5)
    assert jnp.allclose(v, rv, atol=1e-5)

    # ------------------------------------------------------------------
    # Check 2: multi-tile M and K path with nonzero bias and non-128 splits.
    # ------------------------------------------------------------------
    emb_dim2, splits2 = 256, [128, 64, 64]
    B2, S2 = 2, 32                                  # M = 64
    kx2, kw2, kb2, key = jax.random.split(key, 4)
    x2 = jax.random.normal(kx2, (B2, S2, emb_dim2), dtype=jnp.float32)
    w2 = _trunc_normal(kw2, (sum(splits2), emb_dim2))
    b2 = 0.1 * jax.random.normal(kb2, (sum(splits2),), dtype=jnp.float32)

    w_cat2, b_cat2, meta2 = prepare_fused_qkv_params(w2, b2, splits2)
    q2, k2, v2 = fused_qkv_forward(x2, w_cat2, b_cat2, meta2, tm=32, tk=128)
    jax.block_until_ready((q2, k2, v2))

    rq2, rk2, rv2 = _reference(x2, w2, b2, splits2)
    assert jnp.allclose(q2, rq2, atol=1e-4, rtol=1e-4)
    assert jnp.allclose(k2, rk2, atol=1e-4, rtol=1e-4)
    assert jnp.allclose(v2, rv2, atol=1e-4, rtol=1e-4)

    # ------------------------------------------------------------------
    # Check 3: bf16 production dtype, no bias, decode-like single M tile
    # (exercises the deeper weight-buffering path when K has >= 4 steps).
    # ------------------------------------------------------------------
    emb_dim3, splits3 = 512, [128, 128, 128]
    B3, S3 = 1, 8                                   # M = 8
    kx3, kw3, key = jax.random.split(key, 3)
    x3 = jax.random.normal(kx3, (B3, S3, emb_dim3), dtype=jnp.float32).astype(jnp.bfloat16)
    w3 = _trunc_normal(kw3, (sum(splits3), emb_dim3)).astype(jnp.bfloat16)

    w_cat3, b_cat3, meta3 = prepare_fused_qkv_params(w3, None, splits3)
    q3, k3, v3 = fused_qkv_forward(x3, w_cat3, b_cat3, meta3, tk=128)
    jax.block_until_ready((q3, k3, v3))

    rq3, rk3, rv3 = _reference(x3, w3, None, splits3)
    assert q3.dtype == jnp.bfloat16
    assert jnp.allclose(q3.astype(jnp.float32), rq3, atol=3e-2, rtol=3e-2)
    assert jnp.allclose(k3.astype(jnp.float32), rk3, atol=3e-2, rtol=3e-2)
    assert jnp.allclose(v3.astype(jnp.float32), rv3, atol=3e-2, rtol=3e-2)

    print("KERNEL_OK")
</pallas_src>

<mosaic_0001>
module attributes {stable_mosaic.version = 11 : i64} {
  func.func @kernel(%arg0: i32, %arg1: i32, %arg2: memref<16x128xf32, #tpu.memory_space<vmem>>, %arg3: memref<128x384xf32, #tpu.memory_space<vmem>>, %arg4: memref<1x384xf32, #tpu.memory_space<vmem>>, %arg5: memref<16x128xf32, #tpu.memory_space<vmem>>, %arg6: memref<16x128xf32, #tpu.memory_space<vmem>>, %arg7: memref<16x128xf32, #tpu.memory_space<vmem>>, %arg8: memref<16x384xf32, #tpu.memory_space<vmem>>) attributes {dimension_semantics = [#tpu.dimension_semantics<parallel>, #tpu.dimension_semantics<arbitrary>], iteration_bounds = array<i64: 1, 1>, scalar_prefetch = 0 : i64, scratch_operands = 1 : i64, tpu.core_type = #tpu.core_type<tc>, window_params = [{transform_indices = @transform_0, window_bounds = array<i64: 16, 128>}, {transform_indices = @transform_1, window_bounds = array<i64: 128, 384>}, {pipeline_mode = #tpu.pipeline_mode<synchronous>, transform_indices = @transform_2, window_bounds = array<i64: 1, 384>}, {transform_indices = @transform_3, window_bounds = array<i64: 16, 128>}, {transform_indices = @transform_4, window_bounds = array<i64: 16, 128>}, {transform_indices = @transform_5, window_bounds = array<i64: 16, 128>}]} {
    %c0_i32 = arith.constant 0 : i32
    %0 = arith.cmpi eq, %arg1, %c0_i32 : i32
    %1 = arith.extui %0 : i1 to i32
    %c0_i32_0 = arith.constant 0 : i32
    %2 = arith.cmpi ne, %1, %c0_i32_0 : i32
    scf.if %2 {
      %cst_10 = arith.constant 0.000000e+00 : f32
      %12 = vector.broadcast %cst_10 : f32 to vector<16x384xf32>
      %c0_11 = arith.constant 0 : index
      %c0_12 = arith.constant 0 : index
      %13 = vector.load %arg8[%c0_11, %c0_12] : memref<16x384xf32, #tpu.memory_space<vmem>>, vector<16x384xf32>
      tpu.vector_store %arg8[%c0_11, %c0_12], %12 {strides = array<i32>} : memref<16x384xf32, #tpu.memory_space<vmem>>, vector<16x384xf32>,
    } else {
    }
    %c0 = arith.constant 0 : index
    %c0_1 = arith.constant 0 : index
    %3 = vector.load %arg8[%c0, %c0_1] : memref<16x384xf32, #tpu.memory_space<vmem>>, vector<16x384xf32>
    %c0_2 = arith.constant 0 : index
    %c0_3 = arith.constant 0 : index
    %4 = vector.load %arg2[%c0_2, %c0_3] : memref<16x128xf32, #tpu.memory_space<vmem>>, vector<16x128xf32>
    %c0_4 = arith.constant 0 : index
    %c0_5 = arith.constant 0 : index
    %5 = vector.load %arg3[%c0_4, %c0_5] : memref<128x384xf32, #tpu.memory_space<vmem>>, vector<128x384xf32>
    %cst = arith.constant dense<0.000000e+00> : vector<16x384xf32>
    %6 = tpu.matmul %4, %5, %cst {dimension_numbers = #tpu.dot_dimension_numbers<[1], [0], [0], [1], [0, 0, 1, 1], [], []>} : vector<16x128xf32>, vector<128x384xf32>, vector<16x384xf32> -> vector<16x384xf32>
    %7 = arith.addf %3, %6 : vector<16x384xf32>
    %c0_6 = arith.constant 0 : index
    %c0_7 = arith.constant 0 : index
    %8 = vector.load %arg8[%c0_6, %c0_7] : memref<16x384xf32, #tpu.memory_space<vmem>>, vector<16x384xf32>
    tpu.vector_store %arg8[%c0_6, %c0_7], %7 {strides = array<i32>} : memref<16x384xf32, #tpu.memory_space<vmem>>, vector<16x384xf32>,
    %c0_i32_8 = arith.constant 0 : i32
    %9 = arith.cmpi eq, %arg1, %c0_i32_8 : i32
    %10 = arith.extui %9 : i1 to i32
    %c0_i32_9 = arith.constant 0 : i32
    %11 = arith.cmpi ne, %10, %c0_i32_9 : i32
    scf.if %11 {
      %c0_10 = arith.constant 0 : index
      %c0_11 = arith.constant 0 : index
      %12 = vector.load %arg8[%c0_10, %c0_11] : memref<16x384xf32, #tpu.memory_space<vmem>>, vector<16x128xf32>
      %c0_12 = arith.constant 0 : index
      %c0_13 = arith.constant 0 : index
      %13 = vector.load %arg4[%c0_12, %c0_13] : memref<1x384xf32, #tpu.memory_space<vmem>>, vector<1x128xf32>
      %14 = vector.broadcast %13 : vector<1x128xf32> to vector<16x128xf32>
      %15 = arith.addf %12, %14 : vector<16x128xf32>
      %c0_14 = arith.constant 0 : index
      %c0_15 = arith.constant 0 : index
      %16 = vector.load %arg5[%c0_14, %c0_15] : memref<16x128xf32, #tpu.memory_space<vmem>>, vector<16x128xf32>
      tpu.vector_store %arg5[%c0_14, %c0_15], %15 {strides = array<i32>} : memref<16x128xf32, #tpu.memory_space<vmem>>, vector<16x128xf32>,
      %c0_16 = arith.constant 0 : index
      %c128 = arith.constant 128 : index
      %17 = vector.load %arg8[%c0_16, %c128] : memref<16x384xf32, #tpu.memory_space<vmem>>, vector<16x128xf32>
      %c0_17 = arith.constant 0 : index
      %c128_18 = arith.constant 128 : index
      %18 = vector.load %arg4[%c0_17, %c128_18] : memref<1x384xf32, #tpu.memory_space<vmem>>, vector<1x128xf32>
      %19 = vector.broadcast %18 : vector<1x128xf32> to vector<16x128xf32>
      %20 = arith.addf %17, %19 : vector<16x128xf32>
      %c0_19 = arith.constant 0 : index
      %c0_20 = arith.constant 0 : index
      %21 = vector.load %arg6[%c0_19, %c0_20] : memref<16x128xf32, #tpu.memory_space<vmem>>, vector<16x128xf32>
      tpu.vector_store %arg6[%c0_19, %c0_20], %20 {strides = array<i32>} : memref<16x128xf32, #tpu.memory_space<vmem>>, vector<16x128xf32>,
      %c0_21 = arith.constant 0 : index
      %c256 = arith.constant 256 : index
      %22 = vector.load %arg8[%c0_21, %c256] : memref<16x384xf32, #tpu.memory_space<vmem>>, vector<16x128xf32>
      %c0_22 = arith.constant 0 : index
      %c256_23 = arith.constant 256 : index
      %23 = vector.load %arg4[%c0_22, %c256_23] : memref<1x384xf32, #tpu.memory_space<vmem>>, vector<1x128xf32>
      %24 = vector.broadcast %23 : vector<1x128xf32> to vector<16x128xf32>
      %25 = arith.addf %22, %24 : vector<16x128xf32>
      %c0_24 = arith.constant 0 : index
      %c0_25 = arith.constant 0 : index
      %26 = vector.load %arg7[%c0_24, %c0_25] : memref<16x128xf32, #tpu.memory_space<vmem>>, vector<16x128xf32>
      tpu.vector_store %arg7[%c0_24, %c0_25], %25 {strides = array<i32>} : memref<16x128xf32, #tpu.memory_space<vmem>>, vector<16x128xf32>,
    } else {
    }
    return
  }
  func.func @transform_0(%arg0: i32, %arg1: i32) -> (i32, i32) {
    %c0_i32 = arith.constant 0 : i32
    return %arg0, %arg1 : i32, i32
  }
  func.func @transform_1(%arg0: i32, %arg1: i32) -> (i32, i32) {
    %c0_i32 = arith.constant 0 : i32
    %c0_i32_0 = arith.constant 0 : i32
    return %arg1, %c0_i32 : i32, i32
  }
  func.func @transform_2(%arg0: i32, %arg1: i32) -> (i32, i32) {
    %c0_i32 = arith.constant 0 : i32
    %c0_i32_0 = arith.constant 0 : i32
    %c0_i32_1 = arith.constant 0 : i32
    return %c0_i32, %c0_i32_0 : i32, i32
  }
  func.func @transform_3(%arg0: i32, %arg1: i32) -> (i32, i32) {
    %c0_i32 = arith.constant 0 : i32
    %c0_i32_0 = arith.constant 0 : i32
    return %arg0, %c0_i32 : i32, i32
  }
  func.func @transform_4(%arg0: i32, %arg1: i32) -> (i32, i32) {
    %c0_i32 = arith.constant 0 : i32
    %c0_i32_0 = arith.constant 0 : i32
    return %arg0, %c0_i32 : i32, i32
  }
  func.func @transform_5(%arg0: i32, %arg1: i32) -> (i32, i32) {
    %c0_i32 = arith.constant 0 : i32
    %c0_i32_0 = arith.constant 0 : i32
    return %arg0, %c0_i32 : i32, i32
  }
}

</mosaic_0001>

<bundles_post_ra>
// kernel: tpu_custom_call.1
= control target key start
LH: loop header
LB: loop body
LE: loop exit
PB: predicated region body
PF: predicated region fallthrough
CT: control target
= control target key end

     0   :  { %11 = vsyncpa [#allocation4], 0  ;;  %s620_s0 = inlined_call_operand.hbm [shape: f32[16,128], index: 0, kind: input, shape index: {}]   ;;  %s621_s1 = inlined_call_operand.hbm [shape: f32[128,384], index: 1, kind: input, shape index: {}]   ;;  %s622_s2 = inlined_call_operand.vmem [shape: f32[1,384], index: 2, kind: input, shape index: {}]   ;;  %s623_s3 = inlined_call_operand.hbm [shape: f32[16,128], index: 3, kind: output, shape index: {0}]   ;;  %s624_s4 = inlined_call_operand.hbm [shape: f32[16,128], index: 4, kind: output, shape index: {1}]   ;;  %s625_s5 = inlined_call_operand.hbm [shape: f32[16,128], index: 5, kind: output, shape index: {2}]  }
   0x1   :  { %12 = vsyncpa [#allocation7], 0 }
   0x2   :  { %13 = vsyncpa [#allocation5], 0 }
   0x3   :  { %14 = vsyncpa [#allocation10], 0  ;;  %s542_s18 = smov [#allocation3]  }
   0x4   :  { %s20_s19 = sshll.u32 %s542_s18, 4  ;;  %s21_s19 = int_to_ptr.vmem [resolvable:$true] %s20_s19 }
   0x5   :  { %s442_s20 = scalar_lea.vmem %s21_s19, 256  ;;  %p447_p1 = scmp.lt.s32.totalorder %s21_s19, %s21_s19 }
   0x6   :  { %p443_p0 = scmp.ne.s32.totalorder %s21_s19, %s442_s20  ;;  %p448_p2 = scmp.lt.s32.totalorder %s442_s20, %s442_s20 }
   0x8   :  { %p449_p3 = por %p448_p2, %p447_p1 }
   0xa   :  { %p450_p4 = pnand %p449_p3, %p443_p0 }
   0xc   :  { %453 = shalt.err (!%p450_p4)
}
   0xd   :  { %s543_s21 = smov 128   ;;  %s544_s22 = smov 8  }
   0xe   :  { %26 = dma.hbm_to_vmem [thread:$0]  %s620_s0, 256, %s21_s19, [#allocation4], %s543_s21, %s543_s21, %s544_s22  }
   0xf   :  { %s545_s25 = smov [#allocation6]  }
  0x10   :  { %s32_s26 = sshll.u32 %s545_s25, 4  ;;  %s33_s26 = int_to_ptr.vmem [resolvable:$true] %s32_s26 }
  0x11   :  { %s462_s27 = scalar_lea.vmem %s33_s26, 6144  ;;  %p467_p6 = scmp.lt.s32.totalorder %s33_s26, %s33_s26 }
  0x12   :  { %p463_p5 = scmp.ne.s32.totalorder %s33_s26, %s462_s27  ;;  %p468_p7 = scmp.lt.s32.totalorder %s462_s27, %s462_s27 }
  0x14   :  { %p469_p8 = por %p468_p7, %p467_p6 }
  0x16   :  { %p470_p9 = pnand %p469_p8, %p463_p5 }
  0x18   :  { %473 = shalt.err (!%p470_p9)
}
  0x19   :  { %s546_s28 = smov 384   ;;  %s547_s29 = smov 24  }
  0x1a   :  { %38 = dma.hbm_to_vmem [thread:$0]  %s621_s1, 6144, %s33_s26, [#allocation7], %s546_s28, %s546_s28, %s547_s29  }
  0x1b   :  { %534 = dma.done.wait [#allocation4], 256  }
  0x1c   :  { %535 = vsyncadd [#allocation4], 4294967040 }
  0x1d   :  { %536 = dma.done.wait [#allocation7], 6144  }
  0x1e   :  { %537 = vsyncadd [#allocation7], 4294961152  ;;  %v548_v0 = vmov 0.0   ;;  %v111_v1 = vld [vmem:[#allocation6 + $0x170] sm:$0xff]  ;;  %v110_v2 = vld [vmem:[#allocation6 + $0x168] sm:$0xff]  ;;  %s549_s11 = smov [#allocation8]  }
  0x1f   :  { %177 = vmatprep.mubr.f32.mxu0 %v548_v0  ;;  %v108_v3 = vld [vmem:[#allocation6 + $0x158] sm:$0xff]  ;;  %113 = vmatprep.subr.mxu0 %v111_v1  ;;  %v107_v4 = vld [vmem:[#allocation6 + $0x150] sm:$0xff]  ;;  %v105_v6 = vld [vmem:[#allocation6 + $0x140] sm:$0xff]  ;;  %s324_s12 = sshll.u32 %s549_s11, 4  ;;  %s550_s13 = smov [#allocation9]   ;;  %s325_s12 = int_to_ptr.vmem [resolvable:$true] %s324_s12 }
  0x20   :  { %v112_v5 = vld [vmem:[#allocation6 + $0x178] sm:$0xff]  ;;  %114 = vmatpush1.msra.mxu0 %v110_v2  ;;  %v109_v7 = vld [vmem:[#allocation6 + $0x160] sm:$0xff]  ;;  %v106_v9 = vld [vmem:[#allocation6 + $0x148] sm:$0xff]  ;;  %s336_s14 = sshll.u32 %s550_s13, 4  ;;  %s551_s15 = smov [#allocation11]   ;;  %s337_s14 = int_to_ptr.vmem [resolvable:$true] %s336_s14 }
  0x21   :  { %389 = vmatprep.subr.mxu1 %v112_v5  ;;  %115 = vmatprep.subr.mxu0 %v108_v3  ;;  %v104_v8 = vld [vmem:[#allocation6 + $0x138] sm:$0xff]  ;;  %v102_v10 = vld [vmem:[#allocation6 + $0x128] sm:$0xff]  ;;  %v101_v11 = vld [vmem:[#allocation6 + $0x120] sm:$0xff]  ;;  %s348_s16 = sshll.u32 %s551_s15, 4  ;;  %p479_p11 = scmp.lt.s32.totalorder %s325_s12, %s325_s12  ;;  %s349_s16 = int_to_ptr.vmem [resolvable:$true] %s348_s16 }
  0x22   :  { %390 = vmatpush3.msra.mxu1 %v112_v5  ;;  %116 = vmatpush1.msra.mxu0 %v107_v4  ;;  %v103_v12 = vld [vmem:[#allocation6 + $0x130] sm:$0xff]  ;;  %v98_v14 = vld [vmem:[#allocation6 + $0x108] sm:$0xff]  ;;  %v100_v15 = vld [vmem:[#allocation6 + $0x118] sm:$0xff] }
  0x23   :  { %391 = vmatprep.subr.mxu1 %v109_v7  ;;  %117 = vmatprep.subr.mxu0 %v105_v6  ;;  %v99_v13 = vld [vmem:[#allocation6 + $0x110] sm:$0xff]  ;;  %v96_v16 = vld [vmem:[#allocation6 + $0xf8] sm:$0xff]  ;;  %v97_v18 = vld [vmem:[#allocation6 + $0x100] sm:$0xff] }
  0x24   :  { %392 = vmatpush3.msra.mxu1 %v109_v7  ;;  %118 = vmatpush1.msra.mxu0 %v104_v8  ;;  %v95_v17 = vld [vmem:[#allocation6 + $0xf0] sm:$0xff]  ;;  %v93_v19 = vld [vmem:[#allocation6 + $0xe0] sm:$0xff]  ;;  %v92_v20 = vld [vmem:[#allocation6 + $0xd8] sm:$0xff] }
  0x25   :  { %393 = vmatprep.subr.mxu1 %v106_v9  ;;  %119 = vmatprep.subr.mxu0 %v102_v10  ;;  %v94_v21 = vld [vmem:[#allocation6 + $0xe8] sm:$0xff]  ;;  %v89_v23 = vld [vmem:[#allocation6 + $0xc0] sm:$0xff]  ;;  %v91_v24 = vld [vmem:[#allocation6 + $0xd0] sm:$0xff] }
  0x26   :  { %394 = vmatpush3.msra.mxu1 %v106_v9  ;;  %120 = vmatpush1.msra.mxu0 %v101_v11  ;;  %v90_v22 = vld [vmem:[#allocation6 + $0xc8] sm:$0xff]  ;;  %v87_v25 = vld [vmem:[#allocation6 + $0xb0] sm:$0xff]  ;;  %v88_v27 = vld [vmem:[#allocation6 + $0xb8] sm:$0xff] }
  0x27   :  { %395 = vmatprep.subr.mxu1 %v103_v12  ;;  %121 = vmatprep.subr.mxu0 %v99_v13  ;;  %v86_v26 = vld [vmem:[#allocation6 + $0xa8] sm:$0xff]  ;;  %v84_v28 = vld [vmem:[#allocation6 + $0x98] sm:$0xff]  ;;  %v83_v29 = vld [vmem:[#allocation6 + $0x90] sm:$0xff] }
  0x28   :  { %396 = vmatpush3.msra.mxu1 %v103_v12  ;;  %122 = vmatpush1.msra.mxu0 %v98_v14  ;;  %v85_v30 = vld [vmem:[#allocation6 + $0xa0] sm:$0xff]  ;;  %v80_v32 = vld [vmem:[#allocation6 + $0x78] sm:$0xff]  ;;  %v82_v33 = vld [vmem:[#allocation6 + $0x88] sm:$0xff] }
  0x29   :  { %397 = vmatprep.subr.mxu1 %v100_v15  ;;  %123 = vmatprep.subr.mxu0 %v96_v16  ;;  %v81_v31 = vld [vmem:[#allocation6 + $0x80] sm:$0xff]  ;;  %v78_v34 = vld [vmem:[#allocation6 + $0x68] sm:$0xff]  ;;  %v79_v36 = vld [vmem:[#allocation6 + $0x70] sm:$0xff] }
  0x2a   :  { %398 = vmatpush3.msra.mxu1 %v100_v15  ;;  %124 = vmatpush1.msra.mxu0 %v95_v17  ;;  %v77_v35 = vld [vmem:[#allocation6 + $0x60] sm:$0xff]  ;;  %v75_v37 = vld [vmem:[#allocation6 + $0x50] sm:$0xff]  ;;  %v74_v38 = vld [vmem:[#allocation6 + $0x48] sm:$0xff] }
  0x2b   :  { %399 = vmatprep.subr.mxu1 %v97_v18  ;;  %125 = vmatprep.subr.mxu0 %v93_v19  ;;  %v76_v39 = vld [vmem:[#allocation6 + $0x58] sm:$0xff]  ;;  %v71_v41 = vld [vmem:[#allocation6 + $0x30] sm:$0xff]  ;;  %v73_v42 = vld [vmem:[#allocation6 + $0x40] sm:$0xff] }
  0x2c   :  { %400 = vmatpush3.msra.mxu1 %v97_v18  ;;  %126 = vmatpush1.msra.mxu0 %v92_v20  ;;  %v72_v40 = vld [vmem:[#allocation6 + $0x38] sm:$0xff]  ;;  %v69_v43 = vld [vmem:[#allocation6 + $0x20] sm:$0xff]  ;;  %v70_v45 = vld [vmem:[#allocation6 + $0x28] sm:$0xff] }
  0x2d   :  { %401 = vmatprep.subr.mxu1 %v94_v21  ;;  %127 = vmatprep.subr.mxu0 %v90_v22  ;;  %v68_v44 = vld [vmem:[#allocation6 + $0x18] sm:$0xff]  ;;  %v66_v46 = vld [vmem:[#allocation6 + $0x8] sm:$0xff]  ;;  %v65_v47 = vld [vmem:[#allocation6] sm:$0xff] }
  0x2e   :  { %402 = vmatpush3.msra.mxu1 %v94_v21  ;;  %128 = vmatpush1.msra.mxu0 %v89_v23  ;;  %v67_v48 = vld [vmem:[#allocation6 + $0x10] sm:$0xff]  ;;  %v64_v50 = vld [vmem:[#allocation3 + $0x8] sm:$0xff] }
  0x2f   :  { %403 = vmatprep.subr.mxu1 %v91_v24  ;;  %129 = vmatprep.subr.mxu0 %v87_v25  ;;  %v63_v49 = vld [vmem:[#allocation3] sm:$0xff] }
  0x30   :  { %404 = vmatpush3.msra.mxu1 %v91_v24  ;;  %130 = vmatpush1.msra.mxu0 %v86_v26  ;;  %v368_v51 = vld [vmem:[%s622_s2] ss:$0 sm:$0xff]  ;;  %v369_v53 = vld [vmem:[%s622_s2 + $0x1] ss:$0 sm:$0xff]  ;;  %v370_v54 = vld [vmem:[%s622_s2 + $0x2] ss:$0 sm:$0xff] }
  0x31   :  { %405 = vmatprep.subr.mxu1 %v88_v27  ;;  %131 = vmatprep.subr.mxu0 %v84_v28  ;;  %s474_s2 = scalar_lea.vmem %s325_s12, 256 }
  0x32   :  { %406 = vmatpush3.msra.mxu1 %v88_v27  ;;  %132 = vmatpush1.msra.mxu0 %v83_v29  ;;  %p475_p10 = scmp.ne.s32.totalorder %s325_s12, %s474_s2  ;;  %p480_p12 = scmp.lt.s32.totalorder %s474_s2, %s474_s2 }
  0x33   :  { %407 = vmatprep.subr.mxu1 %v85_v30  ;;  %133 = vmatprep.subr.mxu0 %v81_v31 }
  0x34   :  { %408 = vmatpush3.msra.mxu1 %v85_v30  ;;  %134 = vmatpush1.msra.mxu0 %v80_v32  ;;  %p481_p13 = por %p480_p12, %p479_p11 }
  0x35   :  { %409 = vmatprep.subr.mxu1 %v82_v33  ;;  %135 = vmatprep.subr.mxu0 %v78_v34 }
  0x36   :  { %410 = vmatpush3.msra.mxu1 %v82_v33  ;;  %136 = vmatpush1.msra.mxu0 %v77_v35  ;;  %p482_p0 = pnand %p481_p13, %p475_p10 }
  0x37   :  { %411 = vmatprep.subr.mxu1 %v79_v36  ;;  %137 = vmatprep.subr.mxu0 %v75_v37 }
  0x38   :  { %412 = vmatpush3.msra.mxu1 %v79_v36  ;;  %138 = vmatpush1.msra.mxu0 %v74_v38 }
  0x39   :  { %413 = vmatprep.subr.mxu1 %v76_v39  ;;  %139 = vmatprep.subr.mxu0 %v72_v40 }
  0x3a   :  { %414 = vmatpush3.msra.mxu1 %v76_v39  ;;  %140 = vmatpush1.msra.mxu0 %v71_v41 }
  0x3b   :  { %415 = vmatprep.subr.mxu1 %v73_v42  ;;  %141 = vmatprep.subr.mxu0 %v69_v43 }
  0x3c   :  { %416 = vmatpush3.msra.mxu1 %v73_v42  ;;  %142 = vmatpush1.msra.mxu0 %v68_v44 }
  0x3d   :  { %417 = vmatprep.subr.mxu1 %v70_v45  ;;  %143 = vmatprep.subr.mxu0 %v66_v46 }
  0x3e   :  { %418 = vmatpush3.msra.mxu1 %v70_v45  ;;  %144 = vmatpush1.msra.mxu0 %v65_v47 }
  0x3f   :  { %419 = vmatprep.subr.mxu1 %v67_v48  ;;  %178 = vmatmul.mubr.f32.vlgmr.msra.gmra.mxu0 %v63_v49 }
  0x40   :  { %420 = vmatpush3.msra.mxu1 %v67_v48  ;;  %421 = vmatprep.mubr.f32.mxu1 %v63_v49 }
  0x41   :  { %183 = vmatprep.mubr.f32.mxu0 %v548_v0  ;;  %422 = vmatmul.mubr.f32.vlgmr.msra.gmra.mxu1 %v64_v50 }
  0x43   :  { %184 = vmatmul.mubr.f32.gmra.mxu0 %v64_v50 }
  0xff   :  { %v179_v52 = vpop.f32.mrf.mxu0 }
 0x100   :  { %v289_v55 = vadd.f32 %v368_v51, %v179_v52 }
 0x101   :  { %v181_v56 = vpop.f32.mrf.mxu0  ;;  %v423_v57 = vpop.f32.mrf.mxu1 }
 0x102   :  { %291 = vst [vmem:[#allocation8] sm:$0xff] %v289_v55  ;;  %v302_v58 = vadd.f32 %v369_v53, %v181_v56  ;;  %v316_v59 = vadd.f32 %v423_v57, %v370_v54 }
 0x103   :  { %v185_v60 = vpop.f32.mrf.mxu0  ;;  %v256_v61 = vpop.f32.mrf.mxu1 }
 0x104   :  { %304 = vst [vmem:[#allocation9] sm:$0xff] %v302_v58  ;;  %318 = vst [vmem:[#allocation11 + $0x8] sm:$0xff] %v316_v59  ;;  %v290_v62 = vadd.f32 %v368_v51, %v185_v60  ;;  %v315_v63 = vadd.f32 %v370_v54, %v256_v61 }
 0x105   :  { %v187_v0 = vpop.f32.mrf.mxu0 }
 0x106   :  { %292 = vst [vmem:[#allocation8 + $0x8] sm:$0xff] %v290_v62  ;;  %317 = vst [vmem:[#allocation11] sm:$0xff] %v315_v63  ;;  %v303_v1 = vadd.f32 %v369_v53, %v187_v0 }
 0x107   :  { %485 = shalt.err (!%p482_p0)
}
 0x108   :  { %330 = dma.vmem_to_hbm [thread:$0]  %s325_s12, 256, %s623_s3, [#allocation5], %s543_s21, %s543_s21, %s544_s22   ;;  %305 = vst [vmem:[#allocation9 + $0x8] sm:$0xff] %v303_v1 }
 0x109   :  { %s494_s19 = scalar_lea.vmem %s337_s14, 256  ;;  %p499_p2 = scmp.lt.s32.totalorder %s337_s14, %s337_s14 }
 0x10a   :  { %p495_p1 = scmp.ne.s32.totalorder %s337_s14, %s494_s19  ;;  %p500_p3 = scmp.lt.s32.totalorder %s494_s19, %s494_s19 }
 0x10c   :  { %p501_p4 = por %p500_p3, %p499_p2 }
 0x10e   :  { %p502_p5 = pnand %p501_p4, %p495_p1 }
 0x110   :  { %505 = shalt.err (!%p502_p5)
}
 0x111   :  { %342 = dma.vmem_to_hbm [thread:$0]  %s337_s14, 256, %s624_s4, [#allocation10], %s543_s21, %s543_s21, %s544_s22  }
 0x112   :  { %s514_s24 = scalar_lea.vmem %s349_s16, 256  ;;  %p519_p7 = scmp.lt.s32.totalorder %s349_s16, %s349_s16 }
 0x113   :  { %p515_p6 = scmp.ne.s32.totalorder %s349_s16, %s514_s24  ;;  %p520_p8 = scmp.lt.s32.totalorder %s514_s24, %s514_s24 }
 0x115   :  { %p521_p9 = por %p520_p8, %p519_p7 }
 0x117   :  { %p522_p10 = pnand %p521_p9, %p515_p6 }
 0x119   :  { %525 = shalt.err (!%p522_p10)
}
 0x11a   :  { %354 = dma.vmem_to_hbm [thread:$0]  %s349_s16, 256, %s625_s5, [#allocation10], %s543_s21, %s543_s21, %s544_s22  }
 0x11b   :  { %538 = dma.done.wait [#allocation5], 256  }
 0x11c   :  { %539 = vsyncadd [#allocation5], 4294967040 }
 0x11d   :  { %540 = dma.done.wait [#allocation10], 512  }
 0x11e   :  { %541 = vsyncadd [#allocation10], 4294966784 }
 0x11f   :  { %364 = vsyncpa [#allocation4], 1 }
 0x120   :  { %365 = vsyncpa [#allocation7], 1 }
 0x121   :  { %366 = vsyncpa [#allocation5], 1 }
 0x122   :  { %367 = vsyncpa [#allocation10], 1 }

</bundles_post_ra>
